<compile_context>
chip_gen: v6e
topology: v6e:2x2x1
jax: 0.10.0
libtpu: 0.0.40
codegen_flags: <defaults>
</compile_context>

<pallas_src>
import jax
import jax.numpy as jnp
from jax.experimental import pallas as pl
from jax.experimental.pallas import tpu as pltpu

_LANE = 128
_SUBLANE = 8
_TILE_ROWS = 512  # (512, 128) f32 = 256 KiB per tile; ~85% of HBM roofline.


def _linear_kernel(x_ref, w_ref, b_ref, o_ref):
    # y = x * w + b : scalar weight/bias from SMEM, elementwise on the VPU.
    w = w_ref[0]
    b = b_ref[0]
    o_ref[...] = x_ref[...] * w + b


def linear_regression_forward(x, weight, bias, *, tile_rows=_TILE_ROWS):
    """Pallas equivalent of LinearRegressionModel.forward.

    x:      (B, 1) float32
    weight: (1, 1) float32  (nn.Linear weight, [out, in])
    bias:   (1,)   float32
    returns (B, 1) float32
    """
    B, in_features = x.shape
    out_features = weight.shape[0]
    assert in_features == 1 and out_features == 1 and bias.shape == (out_features,)
    dtype = x.dtype

    n = B  # total scalar elements (in_features == 1)
    w_s = weight.reshape(1)  # (1,) scalar parameter for SMEM
    b_s = bias.reshape(1)    # (1,) scalar parameter for SMEM

    # Pack into a lane-dense (rows, 128) slab.
    rows = pl.cdiv(n, _LANE)
    if rows <= tile_rows:
        # Single-shot, grid-less launch: pad rows to a sublane multiple only.
        rows_padded = max(_SUBLANE, pl.cdiv(rows, _SUBLANE) * _SUBLANE)
        tiled = False
    else:
        # Tiled launch: pad rows to a multiple of the tile height.
        rows_padded = pl.cdiv(rows, tile_rows) * tile_rows
        tiled = True

    padded_len = rows_padded * _LANE
    x_flat = x.reshape(-1)
    x_slab = jnp.pad(x_flat, (0, padded_len - n)).reshape(rows_padded, _LANE)

    if not tiled:
        y_slab = pl.pallas_call(
            _linear_kernel,
            out_shape=jax.ShapeDtypeStruct((rows_padded, _LANE), dtype),
            in_specs=[
                pl.BlockSpec(memory_space=pltpu.MemorySpace.VMEM),
                pl.BlockSpec(memory_space=pltpu.MemorySpace.SMEM),
                pl.BlockSpec(memory_space=pltpu.MemorySpace.SMEM),
            ],
            out_specs=pl.BlockSpec(memory_space=pltpu.MemorySpace.VMEM),
        )(x_slab, w_s, b_s)
    else:
        num_tiles = rows_padded // tile_rows
        y_slab = pl.pallas_call(
            _linear_kernel,
            out_shape=jax.ShapeDtypeStruct((rows_padded, _LANE), dtype),
            grid=(num_tiles,),
            in_specs=[
                pl.BlockSpec((tile_rows, _LANE), lambda i: (i, 0)),
                pl.BlockSpec(memory_space=pltpu.MemorySpace.SMEM),
                pl.BlockSpec(memory_space=pltpu.MemorySpace.SMEM),
            ],
            out_specs=pl.BlockSpec((tile_rows, _LANE), lambda i: (i, 0)),
            compiler_params=pltpu.CompilerParams(
                dimension_semantics=("parallel",),
            ),
        )(x_slab, w_s, b_s)

    # Drop padding and restore the (B, 1) shape.
    return y_slab.reshape(-1)[:n].reshape(B, out_features)


if __name__ == "__main__":
    key = jax.random.PRNGKey(0)
    kx, kw, kb, kx2 = jax.random.split(key, 4)

    # Deterministic parameter init mimicking nn.Linear(1, 1):
    # weight, bias ~ U(-1/sqrt(in_features), 1/sqrt(in_features)) = U(-1, 1)
    weight = jax.random.uniform(kw, (1, 1), jnp.float32, minval=-1.0, maxval=1.0)
    bias = jax.random.uniform(kb, (1,), jnp.float32, minval=-1.0, maxval=1.0)

    # Small example input: batch of 8 scalar features (single-shot path).
    x_small = jax.random.normal(kx, (8, 1), jnp.float32)
    y_small = linear_regression_forward(x_small, weight, bias)
    jax.block_until_ready(y_small)
    y_small_ref = x_small @ weight.T + bias
    assert y_small.shape == (8, 1)
    assert jnp.allclose(y_small, y_small_ref, atol=1e-6), "small-batch mismatch"

    # Larger, non-multiple batch to exercise the tiled (grid) path + padding.
    B_big = _TILE_ROWS * _LANE * 2 + 37
    x_big = jax.random.normal(kx2, (B_big, 1), jnp.float32)
    y_big = linear_regression_forward(x_big, weight, bias)
    jax.block_until_ready(y_big)
    y_big_ref = x_big @ weight.T + bias
    assert y_big.shape == (B_big, 1)
    assert jnp.allclose(y_big, y_big_ref, atol=1e-6), "tiled-batch mismatch"

    print("KERNEL_OK")
</pallas_src>

<mosaic_0001>
module attributes {stable_mosaic.version = 11 : i64} {
  func.func @_linear_kernel(%arg0: memref<8x128xf32, #tpu.memory_space<vmem>>, %arg1: memref<1xf32, #tpu.memory_space<smem>>, %arg2: memref<1xf32, #tpu.memory_space<smem>>, %arg3: memref<8x128xf32, #tpu.memory_space<vmem>>) attributes {dimension_semantics = [], scalar_prefetch = 0 : i64, scratch_operands = 0 : i64, tpu.core_type = #tpu.core_type<tc>} {
    %c0 = arith.constant 0 : index
    %0 = memref.load %arg1[%c0] : memref<1xf32, #tpu.memory_space<smem>>
    %c0_0 = arith.constant 0 : index
    %1 = memref.load %arg2[%c0_0] : memref<1xf32, #tpu.memory_space<smem>>
    %c0_1 = arith.constant 0 : index
    %c0_2 = arith.constant 0 : index
    %2 = vector.load %arg0[%c0_1, %c0_2] : memref<8x128xf32, #tpu.memory_space<vmem>>, vector<8x128xf32>
    %3 = vector.broadcast %0 : f32 to vector<8x128xf32>
    %4 = arith.mulf %2, %3 : vector<8x128xf32>
    %5 = vector.broadcast %1 : f32 to vector<8x128xf32>
    %6 = arith.addf %4, %5 : vector<8x128xf32>
    %c0_3 = arith.constant 0 : index
    %c0_4 = arith.constant 0 : index
    %7 = vector.load %arg3[%c0_3, %c0_4] : memref<8x128xf32, #tpu.memory_space<vmem>>, vector<8x128xf32>
    tpu.vector_store %arg3[%c0_3, %c0_4], %6 {strides = array<i32>} : memref<8x128xf32, #tpu.memory_space<vmem>>, vector<8x128xf32>,
    return
  }
}

</mosaic_0001>

<bundles_post_ra>
// kernel: tpu_custom_call.1
= control target key start
LH: loop header
LB: loop body
LE: loop exit
PB: predicated region body
PF: predicated region fallthrough
CT: control target
= control target key end

     0   :  { %10 = vsyncpa [#allocation5], 0  ;;  %s132_s0 = inlined_call_operand.hbm [shape: f32[8,128], index: 0, kind: input, shape index: {}]   ;;  %s133_s1 = inlined_call_operand.<no memory space> [shape: f32[1], index: 1, kind: input, shape index: {}]   ;;  %s134_s2 = inlined_call_operand.<no memory space> [shape: f32[1], index: 2, kind: input, shape index: {}]   ;;  %s135_s3 = inlined_call_operand.hbm [shape: f32[8,128], index: 3, kind: output, shape index: {}]  }
   0x1   :  { %11 = vsyncpa [#allocation6], 0  ;;  %s98_s12 = smov [#allocation4]  }
   0x2   :  { %s18_s13 = sshll.u32 %s98_s12, 4  ;;  %s19_s13 = int_to_ptr.vmem [resolvable:$true] %s18_s13 }
   0x3   :  { %s62_s14 = scalar_lea.vmem %s19_s13, 128  ;;  %p67_p1 = scmp.lt.s32.totalorder %s19_s13, %s19_s13 }
   0x4   :  { %p63_p0 = scmp.ne.s32.totalorder %s19_s13, %s62_s14  ;;  %p68_p2 = scmp.lt.s32.totalorder %s62_s14, %s62_s14 }
   0x6   :  { %p69_p3 = por %p68_p2, %p67_p1 }
   0x8   :  { %p70_p4 = pnand %p69_p3, %p63_p0 }
   0xa   :  { %73 = shalt.err (!%p70_p4)
}
   0xb   :  { %21 = dma.hbm_to_vmem [thread:$0]  %s132_s0, 128, %s19_s13, [#allocation5]  }
   0xc   :  { %94 = dma.done.wait [#allocation5], 128  }
   0xd   :  { %95 = vsyncadd [#allocation5], 4294967168  ;;  %v32_v0 = vstv %s133_s1  ;;  %v31_v1 = vld [vmem:[#allocation4] sm:$0xff]  ;;  %v34_v2 = vstv %s134_s2  ;;  %s99_s21 = smov [#allocation7]  }
   0xe   :  { %s43_s22 = sshll.u32 %s99_s21, 4  ;;  %v33_v3 = vmul.f32 %v32_v0, %v31_v1  ;;  %s44_s22 = int_to_ptr.vmem [resolvable:$true] %s43_s22 }
   0xf   :  { %s74_s23 = scalar_lea.vmem %s44_s22, 128  ;;  %p79_p6 = scmp.lt.s32.totalorder %s44_s22, %s44_s22 }
  0x10   :  { %v35_v4 = vadd.f32 %v34_v2, %v33_v3  ;;  %p75_p5 = scmp.ne.s32.totalorder %s44_s22, %s74_s23  ;;  %p80_p7 = scmp.lt.s32.totalorder %s74_s23, %s74_s23 }
  0x12   :  { %36 = vst [vmem:[#allocation7] sm:$0xff] %v35_v4  ;;  %p81_p8 = por %p80_p7, %p79_p6 }
  0x14   :  { %p82_p9 = pnand %p81_p8, %p75_p5 }
  0x16   :  { %85 = shalt.err (!%p82_p9)
}
  0x17   :  { %46 = dma.vmem_to_hbm [thread:$0]  %s44_s22, 128, %s135_s3, [#allocation6]  }
  0x18   :  { %96 = dma.done.wait [#allocation6], 128  }
  0x19   :  { %97 = vsyncadd [#allocation6], 4294967168 }
  0x1a   :  { %50 = vsyncpa [#allocation5], 1 }
  0x1b   :  { %51 = vsyncpa [#allocation6], 1 }

</bundles_post_ra>
